<compile_context>
chip_gen: v5e
topology: v5e:2x2
jax: 0.10.0
libtpu: 0.0.40
codegen_flags: <defaults>
</compile_context>

<pallas_src>
import jax
import jax.numpy as jnp
from jax.experimental import pallas as pl
from jax.experimental.pallas import tpu as pltpu


def _round_up(x, m):
    return (x + m - 1) // m * m


def _cdiv(a, b):
    return (a + b - 1) // b


def _vmem_limit_bytes():
    # Generation-aware VMEM budget: half of physical VMEM, capped at 64 MiB
    # (=> ~32 MiB on v7x's 64 MiB VMEM, 64 MiB on v5e/v6e's 128 MiB).
    try:
        cap = pltpu.get_tpu_info().vmem_capacity_bytes
    except Exception:
        return 32 * 1024 * 1024
    return int(min(cap // 2, 64 * 1024 * 1024))


# --------------- Pass 1: tiled conv-as-matmul + per-tile BN partial stats ----

def _matmul_stats_kernel(patches_ref, w_ref, y_ref, stats_ref):
    # patches_ref: (TM, Kdim) bf16 ; w_ref: (Kdim, Cp) bf16 (resident across tiles)
    y = jnp.dot(patches_ref[...], w_ref[...],
                preferred_element_type=jnp.float32)          # (TM, Cp), f32 MXU acc

    # Store the activation tile in bf16 (halves HBM write + later re-read traffic).
    y_ref[...] = y.astype(y_ref.dtype)

    # BN partial stats reduced from the f32 accumulator (NOT the bf16 store),
    # packed as rows [sum, sum_of_squares] of a (2, Cp) slab.
    sum_row = jnp.sum(y, axis=0, keepdims=True)              # (1, Cp)
    ssq_row = jnp.sum(y * y, axis=0, keepdims=True)          # (1, Cp)
    stats_ref[...] = jnp.concatenate([sum_row, ssq_row], axis=0)[None]  # (1, 2, Cp)


# --------------- Wrapper ------------------------------------------------------

def _im2col(x, kh, kw, stride, padding):
    """x: (N, C, H, W) -> patches (N*Ho*Wo, C*kh*kw); column order = (C, kh, kw)."""
    n, c, h, w = x.shape
    xp = jnp.pad(x, ((0, 0), (0, 0), (padding, padding), (padding, padding)))
    ho = (h + 2 * padding - kh) // stride + 1
    wo = (w + 2 * padding - kw) // stride + 1
    cols = []
    for i in range(kh):
        for j in range(kw):
            cols.append(xp[:, :, i:i + stride * ho:stride, j:j + stride * wo:stride])
    cols = jnp.stack(cols, axis=0).reshape(kh, kw, n, c, ho, wo)
    cols = cols.transpose(2, 4, 5, 3, 0, 1)                  # (N, Ho, Wo, C, kh, kw)
    return cols.reshape(n * ho * wo, c * kh * kw), ho, wo


def conv_bn_relu(x, weight, gamma, beta, *, stride=1, padding=1,
                 eps=1e-5, activation=True, tile_m=512):
    """x: (N, C_in, H, W) NCHW.  weight: (C_out, C_in, kh, kw).  Returns NCHW f32."""
    n, c_in, _, _ = x.shape
    c_out, _, kh, kw = weight.shape
    kdim = c_in * kh * kw

    # bf16 im2col patches for the MXU (f32 accumulation in-kernel); K stays
    # un-padded in HBM (block dim == full array dim is legal for BlockSpec).
    patches, ho, wo = _im2col(x.astype(jnp.bfloat16), kh, kw, stride, padding)
    m = n * ho * wo

    cp = _round_up(c_out, 128)       # lane-dense output channels
    grid_m = max(1, _cdiv(m, tile_m))
    if grid_m == 1 and m > 256:
        grid_m = 2                   # give both v7x TensorCores a tile / keep the pipeline busy
    tm = _round_up(_cdiv(m, grid_m), 8)
    mp = tm * grid_m
    if mp != m:
        # Zero rows -> zero stats contribution; cropped in the epilogue.
        patches = jnp.pad(patches, ((0, mp - m), (0, 0)))

    w_mat = weight.reshape(c_out, kdim).T.astype(jnp.bfloat16)   # (Kdim, C_out)
    w_mat = jnp.pad(w_mat, ((0, 0), (0, cp - c_out)))

    cparams = pltpu.CompilerParams(
        # Stats are per-tile partials (no resident accumulator), so the M axis is
        # safely "parallel" (megacore sharding on v7x).
        dimension_semantics=("parallel",),
        vmem_limit_bytes=_vmem_limit_bytes(),
    )

    # ---- Pass 1: tiled matmul + partial BN stats (double-buffered over M).
    y, stats = pl.pallas_call(
        _matmul_stats_kernel,
        out_shape=(jax.ShapeDtypeStruct((mp, cp), jnp.bfloat16),
                   jax.ShapeDtypeStruct((grid_m, 2, cp), jnp.float32)),
        grid_spec=pltpu.PrefetchScalarGridSpec(
            num_scalar_prefetch=0,
            grid=(grid_m,),
            in_specs=[
                pl.BlockSpec((tm, kdim), lambda i: (i, 0)),
                pl.BlockSpec((kdim, cp), lambda i: (0, 0)),   # weight resident across M tiles
            ],
            out_specs=(
                pl.BlockSpec((tm, cp), lambda i: (i, 0)),
                pl.BlockSpec((1, 2, cp), lambda i: (i, 0, 0)),
            ),
        ),
        compiler_params=cparams,
    )(patches, w_mat)

    # ---- Finalize global batch stats (tiny grid_m x C_out reduction) and fold BN
    # into one per-channel affine.  Padded rows are exactly zero, so dividing by
    # the true count keeps stats exact.
    count = jnp.float32(m)
    mean = jnp.sum(stats[:, 0, :c_out], axis=0) / count
    var = jnp.maximum(jnp.sum(stats[:, 1, :c_out], axis=0) / count - mean * mean, 0.0)
    inv_std = jax.lax.rsqrt(var + eps)                        # biased var, like PyTorch training BN
    scale = gamma.astype(jnp.float32) * inv_std               # (c_out,)
    shift = beta.astype(jnp.float32) - mean * scale           # (c_out,)

    # ---- Fused XLA epilogue: a single read of bf16 y and a single write of the
    # final NCHW f32 output (affine + ReLU + crop + transpose fuse into one sweep).
    out = y[:m, :c_out].astype(jnp.float32) * scale + shift
    if activation:
        out = jnp.maximum(out, 0.0)
    return out.reshape(n, ho, wo, c_out).transpose(0, 3, 1, 2)


# --------------- Reference & test --------------------------------------------

def _reference(x, weight, gamma, beta, *, stride, padding, eps, activation):
    # Mirrors the kernel's bf16 MXU-input quantization (f32 accumulation / f32 BN).
    # The kernel additionally stores the conv output as bf16; the tolerance in
    # __main__ accounts for that (<= ~1 bf16 ulp of |y| / std after normalization).
    xq = x.astype(jnp.bfloat16).astype(jnp.float32)
    wq = weight.astype(jnp.bfloat16).astype(jnp.float32)
    y = jax.lax.conv_general_dilated(
        xq, wq, window_strides=(stride, stride),
        padding=[(padding, padding), (padding, padding)],
        dimension_numbers=("NCHW", "OIHW", "NCHW"),
        precision=jax.lax.Precision.HIGHEST,
    )
    mean = jnp.mean(y, axis=(0, 2, 3), keepdims=True)
    var = jnp.mean((y - mean) ** 2, axis=(0, 2, 3), keepdims=True)
    y = (y - mean) * jax.lax.rsqrt(var + eps)
    y = y * gamma.reshape(1, -1, 1, 1) + beta.reshape(1, -1, 1, 1)
    if activation:
        y = jnp.maximum(y, 0.0)
    return y


if __name__ == "__main__":
    # Module config: ConvBNReLU(c_in=4, c_out=8, kernel_size=3, stride=1, padding=1)
    N, C_IN, H, W = 2, 4, 16, 16
    C_OUT, K = 8, 3
    STRIDE, PADDING = 1, 1

    key = jax.random.PRNGKey(0)
    kx, kw_, kg, kb = jax.random.split(key, 4)
    x = jax.random.normal(kx, (N, C_IN, H, W), dtype=jnp.float32)
    weight = jax.random.normal(kw_, (C_OUT, C_IN, K, K), dtype=jnp.float32) * 0.1
    gamma = 1.0 + 0.1 * jax.random.normal(kg, (C_OUT,), dtype=jnp.float32)
    beta = 0.1 * jax.random.normal(kb, (C_OUT,), dtype=jnp.float32)

    out = conv_bn_relu(x, weight, gamma, beta,
                       stride=STRIDE, padding=PADDING, activation=True)
    out = jax.block_until_ready(out)

    ref = _reference(x, weight, gamma, beta,
                     stride=STRIDE, padding=PADDING, eps=1e-5, activation=True)
    assert out.shape == (N, C_OUT, H, W)
    # Tolerance covers the bf16 y intermediate introduced for HBM-traffic reasons.
    assert jnp.allclose(out, ref, atol=2e-2, rtol=2e-2), "mismatch vs reference"

    print("KERNEL_OK")
</pallas_src>

<mosaic_0001>
module attributes {stable_mosaic.version = 11 : i64} {
  func.func @_matmul_stats_kernel(%arg0: i32, %arg1: memref<256x36xbf16, #tpu.memory_space<vmem>>, %arg2: memref<36x128xbf16, #tpu.memory_space<vmem>>, %arg3: memref<256x128xbf16, #tpu.memory_space<vmem>>, %arg4: memref<1x2x128xf32, #tpu.memory_space<vmem>>) attributes {dimension_semantics = [#tpu.dimension_semantics<parallel>], iteration_bounds = array<i64: 2>, scalar_prefetch = 0 : i64, scratch_operands = 0 : i64, tpu.core_type = #tpu.core_type<tc>, window_params = [{transform_indices = @transform_0, window_bounds = array<i64: 256, 36>}, {pipeline_mode = #tpu.pipeline_mode<synchronous>, transform_indices = @transform_1, window_bounds = array<i64: 36, 128>}, {transform_indices = @transform_2, window_bounds = array<i64: 256, 128>}, {transform_indices = @transform_3, window_bounds = array<i64: 1, 2, 128>}]} {
    %c0 = arith.constant 0 : index
    %c0_0 = arith.constant 0 : index
    %0 = vector.load %arg1[%c0, %c0_0] : memref<256x36xbf16, #tpu.memory_space<vmem>>, vector<256x36xbf16>
    %c0_1 = arith.constant 0 : index
    %c0_2 = arith.constant 0 : index
    %1 = vector.load %arg2[%c0_1, %c0_2] : memref<36x128xbf16, #tpu.memory_space<vmem>>, vector<36x128xbf16>
    %cst = arith.constant dense<0.000000e+00> : vector<256x128xf32>
    %2 = tpu.matmul %0, %1, %cst {dimension_numbers = #tpu.dot_dimension_numbers<[1], [0], [0], [1], [0, 0, 1, 1], [], []>} : vector<256x36xbf16>, vector<36x128xbf16>, vector<256x128xf32> -> vector<256x128xf32>
    %3 = arith.truncf %2 : vector<256x128xf32> to vector<256x128xbf16>
    %c0_3 = arith.constant 0 : index
    %c0_4 = arith.constant 0 : index
    %4 = vector.load %arg3[%c0_3, %c0_4] : memref<256x128xbf16, #tpu.memory_space<vmem>>, vector<256x128xbf16>
    tpu.vector_store %arg3[%c0_3, %c0_4], %3 {strides = array<i32>} : memref<256x128xbf16, #tpu.memory_space<vmem>>, vector<256x128xbf16>,
    %cst_5 = arith.constant dense<0.000000e+00> : vector<128xf32>
    %5 = vector.multi_reduction <add>, %2, %cst_5 [0] : vector<256x128xf32> to vector<128xf32>
    %6 = vector.shape_cast %5 : vector<128xf32> to vector<1x128xf32>
    %7 = arith.mulf %2, %2 : vector<256x128xf32>
    %cst_6 = arith.constant dense<0.000000e+00> : vector<128xf32>
    %8 = vector.multi_reduction <add>, %7, %cst_6 [0] : vector<256x128xf32> to vector<128xf32>
    %9 = vector.shape_cast %8 : vector<128xf32> to vector<1x128xf32>
    %10 = tpu.concatenate %6, %9 in 0 : vector<1x128xf32>, vector<1x128xf32> -> vector<2x128xf32>
    %11 = vector.shape_cast %10 : vector<2x128xf32> to vector<1x2x128xf32>
    %c0_7 = arith.constant 0 : index
    %c0_8 = arith.constant 0 : index
    %c0_9 = arith.constant 0 : index
    %12 = vector.load %arg4[%c0_7, %c0_8, %c0_9] : memref<1x2x128xf32, #tpu.memory_space<vmem>>, vector<1x2x128xf32>
    tpu.vector_store %arg4[%c0_7, %c0_8, %c0_9], %11 {strides = array<i32>} : memref<1x2x128xf32, #tpu.memory_space<vmem>>, vector<1x2x128xf32>,
    return
  }
  func.func @transform_0(%arg0: i32) -> (i32, i32) {
    %c0_i32 = arith.constant 0 : i32
    %c0_i32_0 = arith.constant 0 : i32
    return %arg0, %c0_i32 : i32, i32
  }
  func.func @transform_1(%arg0: i32) -> (i32, i32) {
    %c0_i32 = arith.constant 0 : i32
    %c0_i32_0 = arith.constant 0 : i32
    %c0_i32_1 = arith.constant 0 : i32
    return %c0_i32, %c0_i32_0 : i32, i32
  }
  func.func @transform_2(%arg0: i32) -> (i32, i32) {
    %c0_i32 = arith.constant 0 : i32
    %c0_i32_0 = arith.constant 0 : i32
    return %arg0, %c0_i32 : i32, i32
  }
  func.func @transform_3(%arg0: i32) -> (i32, i32, i32) {
    %c0_i32 = arith.constant 0 : i32
    %c0_i32_0 = arith.constant 0 : i32
    %c0_i32_1 = arith.constant 0 : i32
    return %arg0, %c0_i32, %c0_i32_0 : i32, i32, i32
  }
}

</mosaic_0001>

<bundles_post_ra>
// kernel: tpu_custom_call.1
= control target key start
LH: loop header
LB: loop body
LE: loop exit
PB: predicated region body
PF: predicated region fallthrough
CT: control target
= control target key end

     0   :  { %9 = vsyncpa [#allocation3], 0  ;;  %s1452_s0 = inlined_call_operand.vmem [shape: bf16[512,36], index: 0, kind: input, shape index: {}]   ;;  %s1453_s1 = inlined_call_operand.vmem [shape: bf16[36,128], index: 1, kind: input, shape index: {}]   ;;  %s1454_s2 = inlined_call_operand.hbm [shape: bf16[512,128], index: 2, kind: output, shape index: {0}]   ;;  %s1455_s3 = inlined_call_operand.hbm [shape: f32[2,2,128], index: 3, kind: output, shape index: {1}]  }
   0x1   :  { %11 = vsyncpa [#allocation3 + $0x1], 0 }
   0x2   :  { %12 = vsyncpa [#allocation5], 0 }
   0x3   :  { %14 = vsyncpa [#allocation5 + $0x1], 0  ;;  %s1151_s12 = smov 0   ;;  %s1153_s13 = smov 0  }
   0x4   :  { %s1155_s14 = smov 0   ;;  %s1157_s15 = smov 0  }
   0x5 LB: > { %s1172_s16 = sadd.s32 4294967295, %s1127_s15   ;;  %s761_s17 = sadd.s32 4294967294, %s1127_s15   ;;  %s1127_s15 = sphi %s1157_s15, %s1461_s15   ;;  %s1123_s14 = sphi %s1155_s14, %s1460_s14   ;;  %s1119_s13 = sphi %s1153_s13, %s1459_s13   ;;  %s1115_s12 = sphi %s1151_s12, %s1458_s12  }
   0x6   : > { %s1176_s18 = sadd.s32 1, %s1127_s15   ;;  %s74_s19 = sadd.s32 1, %s1123_s14 }
   0x7   : > { %s71_s20 = ssub.s32 %s1127_s15, %s1176_s18  ;;  %p84_p0 = scmp.ne.s32.totalorder %s1123_s14, %s1119_s13 }
   0x8   : > { %p72_p1 = scmp.eq.s32.totalorder %s71_s20, 0  ;;  %p85_p2 = scmp.eq.s32.totalorder %s1172_s16, 1 }
   0x9   : > { %p90_p3 = scmp.ne.s32.totalorder %s1119_s13, %s1115_s12  ;;  %p91_p4 = scmp.eq.s32.totalorder %s761_s17, 1 }
   0xa   : > { %s1187_s21 = scalar_select %p72_p1, %s1123_s14, %s74_s19  }
   0xb   : > { %p1189_p5 = por %p85_p2, %p84_p0  ;;  %p1193_p6 = por %p91_p4, %p90_p3 }
   0xc   : > { %p764_p7 = scmp.ge.s32.totalorder %s1127_s15, 1  ;;  %p147_p8 = scmp.lt.s32.totalorder %s1127_s15, 3 }
   0xe   : > { %p148_p9 = pnand %p764_p7, %p147_p8 }
   0xf   : > { %s767_s26 = sshll.u32 (!%p148_p9), %s1172_s16, 5  ;;  %s1249_s8 = sand.u32 (!%p148_p9), 1, %s1119_s13  }
  0x10   : > { %151 = sbr.rel (%p148_p9) target bundleno = 288 (0x120), region = 28  ;;  %p177_p10 = scmp.lt.s32.totalorder (!%p148_p9), %s767_s26, 63 }
  0x11   : > { %s765_s9 = sshll.u32 (!%p148_p9), %s1249_s8, 7  ;;  %s882_s11 = sshll.u32 (!%p148_p9), %s1172_s16, 7 }
  0x12   : > { %s1260_s10 = scalar_lea.vmem (!%p148_p9), [#allocation2], %s765_s9  ;;  %s648_s20 = scalar_lea.hbm (!%p148_p9), %s1454_s2, %s882_s11 }
  0x13   : > { %s649_s24 = sshll.u32 (!%p148_p9), %s1260_s10, 4  ;;  %s651_s25 = sshll.u32 (!%p148_p9), %s648_s20, 4  ;;  %s1347_s24 = int_to_ptr.vmem [resolvable:$true] %s649_s24  ;;  %s652_s25 = int_to_ptr.hbm [resolvable:$true] %s651_s25 }
  0x14   : > { %s1047_s27 = sshra.s32 (!%p148_p9), %s652_s25, 4  ;;  %s1053_s4 = scalar_lea.hbm (!%p148_p9), %s1454_s2, 256  ;;  %s1048_s27 = int_to_ptr.hbm [resolvable:$true] %s1047_s27 }
  0x15   : > { %v220_v0 = vld [vmem:[%s1453_s1 + $0x10] sm:$0x3]  ;;  %vm365_vm0 = vcmask 1041408   ;;  %s1463_s26 = smov (!%p177_p10, %s767_s26), 63  ;;  %v881_v4 = vld [vmem:[%s1453_s1 + $0x8] sm:$0xff]  ;;  %v880_v5 = vld [vmem:[%s1453_s1] sm:$0xff]  ;;  %p1054_p0 = scmp.lt.s32.totalorder %s1048_s27, %s1454_s2 }
  0x16   : > { %v310_v1 = vunpack.c.l.b16 %v220_v0  ;;  %s768_s29 = sshll.u32 %s1463_s26, 2  ;;  %vm316_vm1 = vcmask 293888   ;;  %s632_s26 = scalar_lea.sflag [#allocation3], %s1249_s8 }
  0x17   : > { %s1212_s7 = scalar_lea.vmem %s1452_s0, %s768_s29  ;;  %s1049_s28 = scalar_lea.hbm %s1048_s27, 128 }
  0x18   : > { %v313_v2 = vpack.c.b16 %v310_v1, %v310_v1  ;;  %v864_v6 = vld [vmem:[%s1212_s7] sm:$0xff]  ;;  %v865_v10 = vld [vmem:[%s1212_s7 + $0x8] sm:$0xff]  ;;  %v866_v14 = vld [vmem:[%s1212_s7 + $0x10] sm:$0xff]  ;;  %p1050_p11 = scmp.ne.s32.totalorder %s1048_s27, %s1049_s28  ;;  %p1055_p1 = scmp.lt.s32.totalorder %s1053_s4, %s1049_s28 }
  0x19   : > { %v868_v7 = vld [vmem:[%s1212_s7 + $0x20] sm:$0xff]  ;;  %v869_v11 = vld [vmem:[%s1212_s7 + $0x28] sm:$0xff]  ;;  %v870_v15 = vld [vmem:[%s1212_s7 + $0x30] sm:$0xff] }
  0x1a   : > { %v367_v3 = vsel %vm365_vm0, %v313_v2, 0  ;;  %v872_v8 = vld [vmem:[%s1212_s7 + $0x40] sm:$0xff]  ;;  %v873_v12 = vld [vmem:[%s1212_s7 + $0x48] sm:$0xff]  ;;  %v874_v16 = vld [vmem:[%s1212_s7 + $0x50] sm:$0xff]  ;;  %p1051_p12 = pnand %p1050_p11, %p1189_p5  ;;  %p1056_p2 = por %p1055_p1, %p1054_p0 }
  0x1b   : > { %374 = vmatpush.bf16.msra.mxu0 %v367_v3  ;;  %978 = vmatpush.bf16.msra.mxu1 %v367_v3  ;;  %v876_v9 = vld [vmem:[%s1212_s7 + $0x60] sm:$0xff]  ;;  %v877_v13 = vld [vmem:[%s1212_s7 + $0x68] sm:$0xff]  ;;  %v878_v17 = vld [vmem:[%s1212_s7 + $0x70] sm:$0xff] }
  0x1c   : > { %979 = vmatpush.bf16.msra.mxu2 %v367_v3  ;;  %980 = vmatpush.bf16.msra.mxu3 %v367_v3  ;;  %v867_v18 = vld [vmem:[%s1212_s7 + $0x18] sm:$0xff]  ;;  %p1052_p13 = pneg %p1051_p12 }
  0x1d   : > { %v871_v19 = vld [vmem:[%s1212_s7 + $0x38] sm:$0xff] }
  0x1e   : > { %v875_v20 = vld [vmem:[%s1212_s7 + $0x58] sm:$0xff]  ;;  %p1057_p3 = pnand %p1056_p2, %p1052_p13 }
  0x1f   : > { %375 = vmatpush.bf16.msra.mxu0 %v881_v4  ;;  %981 = vmatpush.bf16.msra.mxu1 %v881_v4  ;;  %v879_v21 = vld [vmem:[%s1212_s7 + $0x78] sm:$0xff] }
  0x20   : > { %982 = vmatpush.bf16.msra.mxu2 %v881_v4  ;;  %983 = vmatpush.bf16.msra.mxu3 %v881_v4 }
  0x23   : > { %376 = vmatpush.bf16.msra.mxu0 %v880_v5  ;;  %984 = vmatpush.bf16.msra.mxu1 %v880_v5 }
  0x24   : > { %985 = vmatpush.bf16.msra.mxu2 %v880_v5  ;;  %986 = vmatpush.bf16.msra.mxu3 %v880_v5 }
  0x26   : > { %841 = vmatmul.msk.bf16.vlgmr.msra.gmra.mxu0 %vm316_vm1, %v864_v6  ;;  %845 = vmatmul.msk.bf16.vlgmr.msra.gmra.mxu1 %vm316_vm1, %v868_v7 }
  0x27   : > { %849 = vmatmul.msk.bf16.vlgmr.msra.gmra.mxu2 %vm316_vm1, %v872_v8  ;;  %853 = vmatmul.msk.bf16.vlgmr.msra.gmra.mxu3 %vm316_vm1, %v876_v9 }
  0x36   : > { %842 = vmatmul.msk.bf16.gmra.mxu0 %vm316_vm1, %v865_v10  ;;  %846 = vmatmul.msk.bf16.gmra.mxu1 %vm316_vm1, %v869_v11 }
  0x37   : > { %850 = vmatmul.msk.bf16.gmra.mxu2 %vm316_vm1, %v873_v12  ;;  %854 = vmatmul.msk.bf16.gmra.mxu3 %vm316_vm1, %v877_v13 }
  0x46   : > { %843 = vmatmul.msk.bf16.gmra.mxu0 %vm316_vm1, %v866_v14  ;;  %847 = vmatmul.msk.bf16.gmra.mxu1 %vm316_vm1, %v870_v15 }
  0x47   : > { %851 = vmatmul.msk.bf16.gmra.mxu2 %vm316_vm1, %v874_v16  ;;  %855 = vmatmul.msk.bf16.gmra.mxu3 %vm316_vm1, %v878_v17 }
  0x56   : > { %844 = vmatmul.msk.bf16.gmra.mxu0 %vm316_vm1, %v867_v18  ;;  %848 = vmatmul.msk.bf16.gmra.mxu1 %vm316_vm1, %v871_v19 }
  0x57   : > { %852 = vmatmul.msk.bf16.gmra.mxu2 %vm316_vm1, %v875_v20  ;;  %856 = vmatmul.msk.bf16.gmra.mxu3 %vm316_vm1, %v879_v21 }
  0xa3   : > { %v378_v22 = vpop.f32.mrf.mxu0  ;;  %v1246_v23 = vpop.f32.mrf.mxu1 }
  0xa4   : > { %v559_v55 = vmul.f32 %v378_v22, %v378_v22 }
  0xaa   : > { %v1252_v24 = vpop.f32.mrf.mxu2  ;;  %v1258_v29 = vpop.f32.mrf.mxu3 }
  0xab   : > { %v380_v25 = vpop.f32.mrf.mxu0  ;;  %v1254_v26 = vpop.f32.mrf.mxu1 }
  0xac   : > { %v886_v27 = vpack.c.bf16 %v380_v25, %v378_v22  ;;  %v906_v28 = vpack.c.bf16 %v1254_v26, %v1246_v23  ;;  %v560_v54 = vmul.f32 %v380_v25, %v380_v25  ;;  %v522_v57 = vadd.f32 %v380_v25, %v378_v22 }
  0xad   : > { %v567_v25 = vmul.f32 %v1246_v23, %v1246_v23 }
  0xae   : > { %887 = vst [vmem:[%s1260_s10] sm:$0xff] %v886_v27   ;;  %v591_v58 = vadd.f32 %v560_v54, %v559_v55 }
  0xaf   : > { %966 = vst [vmem:[%s1260_s10 + $0x20] sm:$0xff] %v906_v28  }
  0xb2   : > { %v1264_v30 = vpop.f32.mrf.mxu2  ;;  %v1270_v34 = vpop.f32.mrf.mxu3 }
  0xb3   : > { %v383_v31 = vpop.f32.mrf.mxu0  ;;  %v1266_v32 = vpop.f32.mrf.mxu1  ;;  %v926_v33 = vpack.c.bf16 %v1264_v30, %v1252_v24  ;;  %v946_v35 = vpack.c.bf16 %v1270_v34, %v1258_v29 }
  0xb4   : > { %v561_v56 = vmul.f32 %v383_v31, %v383_v31  ;;  %v523_v60 = vadd.f32 %v522_v57, %v383_v31 }
  0xb5   : > { %970 = vst [vmem:[%s1260_s10 + $0x40] sm:$0xff] %v926_v33  }
  0xb6   : > { %974 = vst [vmem:[%s1260_s10 + $0x60] sm:$0xff] %v946_v35   ;;  %v592_v62 = vadd.f32 %v591_v58, %v561_v56 }
  0xba   : > { %v1276_v36 = vpop.f32.mrf.mxu2  ;;  %v1282_v41 = vpop.f32.mrf.mxu3 }
  0xbb   : > { %v385_v37 = vpop.f32.mrf.mxu0  ;;  %v1278_v38 = vpop.f32.mrf.mxu1 }
  0xbc   : > { %v891_v39 = vpack.c.bf16 %v385_v37, %v383_v31  ;;  %v911_v40 = vpack.c.bf16 %v1278_v38, %v1266_v32  ;;  %v562_v59 = vmul.f32 %v385_v37, %v385_v37  ;;  %v524_v3 = vadd.f32 %v523_v60, %v385_v37 }
  0xbd   : > { %v568_v31 = vmul.f32 %v1254_v26, %v1254_v26  ;;  %v569_v37 = vmul.f32 %v1266_v32, %v1266_v32 }
  0xbe   : > { %963 = vst [vmem:[%s1260_s10 + $0x8] sm:$0xff] %v891_v39   ;;  %v593_v5 = vadd.f32 %v592_v62, %v562_v59 }
  0xbf   : > { %967 = vst [vmem:[%s1260_s10 + $0x28] sm:$0xff] %v911_v40  }
  0xc2   : > { %v1286_v42 = vpop.f32.mrf.mxu2  ;;  %v1292_v46 = vpop.f32.mrf.mxu3 }
  0xc3   : > { %v388_v43 = vpop.f32.mrf.mxu0  ;;  %v1288_v44 = vpop.f32.mrf.mxu1  ;;  %v931_v45 = vpack.c.bf16 %v1286_v42, %v1276_v36  ;;  %v951_v47 = vpack.c.bf16 %v1292_v46, %v1282_v41 }
  0xc4   : > { %v563_v63 = vmul.f32 %v388_v43, %v388_v43  ;;  %v525_v8 = vadd.f32 %v524_v3, %v388_v43 }
  0xc5   : > { %971 = vst [vmem:[%s1260_s10 + $0x48] sm:$0xff] %v931_v45   ;;  %v570_v45 = vmul.f32 %v1278_v38, %v1278_v38 }
  0xc6   : > { %975 = vst [vmem:[%s1260_s10 + $0x68] sm:$0xff] %v951_v47   ;;  %v594_v9 = vadd.f32 %v593_v5, %v563_v63 }
  0xca   : > { %v1298_v48 = vpop.f32.mrf.mxu2  ;;  %v1304_v53 = vpop.f32.mrf.mxu3 }
  0xcb   : > { %v390_v49 = vpop.f32.mrf.mxu0  ;;  %v1300_v50 = vpop.f32.mrf.mxu1 }
  0xcc   : > { %v896_v51 = vpack.c.bf16 %v390_v49, %v388_v43  ;;  %v916_v52 = vpack.c.bf16 %v1300_v50, %v1288_v44  ;;  %v564_v6 = vmul.f32 %v390_v49, %v390_v49  ;;  %v526_v11 = vadd.f32 %v525_v8, %v390_v49 }
  0xce   : > { %964 = vst [vmem:[%s1260_s10 + $0x10] sm:$0xff] %v896_v51   ;;  %v595_v12 = vadd.f32 %v594_v9, %v564_v6  ;;  %v571_v51 = vmul.f32 %v1288_v44, %v1288_v44 }
  0xcf   : > { %968 = vst [vmem:[%s1260_s10 + $0x30] sm:$0xff] %v916_v52  }
  0xd2   : > { %v1308_v61 = vpop.f32.mrf.mxu2  ;;  %v1314_v4 = vpop.f32.mrf.mxu3 }
  0xd3   : > { %v393_v0 = vpop.f32.mrf.mxu0  ;;  %v1310_v1 = vpop.f32.mrf.mxu1  ;;  %v936_v2 = vpack.c.bf16 %v1308_v61, %v1298_v48  ;;  %v956_v7 = vpack.c.bf16 %v1314_v4, %v1304_v53 }
  0xd4   : > { %v565_v10 = vmul.f32 %v393_v0, %v393_v0  ;;  %v527_v13 = vadd.f32 %v526_v11, %v393_v0 }
  0xd5   : > { %972 = vst [vmem:[%s1260_s10 + $0x50] sm:$0xff] %v936_v2  }
  0xd6   : > { %976 = vst [vmem:[%s1260_s10 + $0x70] sm:$0xff] %v956_v7   ;;  %v596_v15 = vadd.f32 %v595_v12, %v565_v10 }
  0xda   : > { %v1320_v14 = vpop.f32.mrf.mxu2  ;;  %v1323_v22 = vpop.f32.mrf.mxu3 }
  0xdb   : > { %v395_v16 = vpop.f32.mrf.mxu0  ;;  %v415_v17 = vpop.f32.mrf.mxu1 }
  0xdc   : > { %v901_v18 = vpack.c.bf16 %v395_v16, %v393_v0  ;;  %v528_v19 = vadd.f32 %v527_v13, %v395_v16  ;;  %v566_v20 = vmul.f32 %v395_v16, %v395_v16  ;;  %v921_v21 = vpack.c.bf16 %v415_v17, %v1310_v1 }
  0xde   : > { %965 = vst [vmem:[%s1260_s10 + $0x18] sm:$0xff] %v901_v18   ;;  %v529_v27 = vadd.f32 %v528_v19, %v1246_v23  ;;  %v597_v28 = vadd.f32 %v596_v15, %v566_v20 }
  0xdf   : > { %969 = vst [vmem:[%s1260_s10 + $0x38] sm:$0xff] %v921_v21  }
  0xe0   : > { %v530_v33 = vadd.f32 %v529_v27, %v1254_v26  ;;  %v598_v35 = vadd.f32 %v597_v28, %v567_v25 }
  0xe2   : > { %v531_v39 = vadd.f32 %v530_v33, %v1266_v32  ;;  %v599_v23 = vadd.f32 %v598_v35, %v568_v31  ;;  %v435_v40 = vpop.f32.mrf.mxu2  ;;  %v1345_v49 = vpop.f32.mrf.mxu3 }
  0xe3   : > { %v941_v43 = vpack.c.bf16 %v435_v40, %v1320_v14  ;;  %v961_v32 = vpack.c.bf16 %v1345_v49, %v1323_v22 }
  0xe4   : > { %v600_v47 = vadd.f32 %v599_v23, %v569_v37  ;;  %v532_v26 = vadd.f32 %v531_v39, %v1278_v38  ;;  %v572_v38 = vmul.f32 %v1300_v50, %v1300_v50 }
  0xe5   : > { %973 = vst [vmem:[%s1260_s10 + $0x58] sm:$0xff] %v941_v43  }
  0xe6   : > { %v533_v52 = vadd.f32 %v532_v26, %v1288_v44  ;;  %v601_v54 = vadd.f32 %v600_v47, %v570_v45  ;;  %977 = vst [vmem:[%s1260_s10 + $0x78] sm:$0xff] %v961_v32  }
  0xe8   : > { %v534_v55 = vadd.f32 %v533_v52, %v1300_v50  ;;  %v602_v56 = vadd.f32 %v601_v54, %v571_v51 }
  0xe9   : > { %1060 = shalt.err (!%p1057_p3)
}
  0xea   : > { %s1129_s7 = smov 64   ;;  %s1130_s9 = smov 4   ;;  %v535_v44 = vadd.f32 %v534_v55, %v1310_v1  ;;  %v573_v50 = vmul.f32 %v1310_v1, %v1310_v1  ;;  %v603_v57 = vadd.f32 %v602_v56, %v572_v38  ;;  %v574_v60 = vmul.f32 %v415_v17, %v415_v17 }
  0xeb   : > { %987 = dma.vmem_to_hbm [thread:$0]  (%p1189_p5), %s1347_s24, 2048, %s652_s25, %s632_s26, %s1129_s7, %s1129_s7, %s1130_s9   ;;  %v575_v62 = vmul.f32 %v1252_v24, %v1252_v24  ;;  %v576_v2 = vmul.f32 %v1264_v30, %v1264_v30  ;;  %v577_v6 = vmul.f32 %v1276_v36, %v1276_v36  ;;  %v578_v8 = vmul.f32 %v1286_v42, %v1286_v42 }
  0xec   : > { %v604_v58 = vadd.f32 %v603_v57, %v573_v50  ;;  %v536_v59 = vadd.f32 %v535_v44, %v415_v17  ;;  %v580_v13 = vmul.f32 %v1308_v61, %v1308_v61  ;;  %v581_v17 = vmul.f32 %v1320_v14, %v1320_v14  ;;  %s766_s10 = sshll.u32 %s1249_s8, 1  ;;  %s861_s11 = sshll.u32 %s1172_s16, 1 }
  0xed   : > { %v582_v19 = vmul.f32 %v435_v40, %v435_v40  ;;  %v583_v20 = vmul.f32 %v1258_v29, %v1258_v29  ;;  %v584_v25 = vmul.f32 %v1270_v34, %v1270_v34  ;;  %v585_v28 = vmul.f32 %v1282_v41, %v1282_v41  ;;  %s664_s20 = scalar_lea.hbm %s1455_s3, %s861_s11  ;;  %s175_s24 = scalar_lea.vmem [#allocation4], %s766_s10 }
  0xee   : > { %v537_v63 = vadd.f32 %v536_v59, %v1252_v24  ;;  %v605_v0 = vadd.f32 %v604_v58, %v574_v60  ;;  %v579_v24 = vmul.f32 %v1298_v48, %v1298_v48  ;;  %v586_v33 = vmul.f32 %v1292_v46, %v1292_v46  ;;  %s666_s25 = sshll.u32 %s175_s24, 4  ;;  %s668_s26 = sshll.u32 %s664_s20, 4  ;;  %s667_s25 = int_to_ptr.vmem [resolvable:$true] %s666_s25  ;;  %s669_s26 = int_to_ptr.hbm [resolvable:$true] %s668_s26 }
  0xef   : > { %vm628_vm2 = vcmask 1040384   ;;  %s637_s16 = scalar_lea.sflag [#allocation5], %s1249_s8  ;;  %s1075_s27 = sshra.s32 %s669_s26, 4  ;;  %s1076_s27 = int_to_ptr.hbm [resolvable:$true] %s1075_s27 }
  0xf0   : > { %v538_v3 = vadd.f32 %v537_v63, %v1264_v30  ;;  %v606_v5 = vadd.f32 %v605_v0, %v575_v62  ;;  %s1077_s28 = scalar_lea.hbm %s1076_s27, 2  ;;  %s1081_s4 = scalar_lea.hbm %s1455_s3, 4 }
  0xf1   : > { %p1078_p4 = scmp.ne.s32.totalorder %s1076_s27, %s1077_s28  ;;  %p1082_p9 = scmp.lt.s32.totalorder %s1076_s27, %s1455_s3 }
  0xf2   : > { %v539_v1 = vadd.f32 %v538_v3, %v1276_v36  ;;  %v607_v7 = vadd.f32 %v606_v5, %v576_v2  ;;  %p1083_p10 = scmp.lt.s32.totalorder %s1081_s4, %s1077_s28 }
  0xf3   : > { %p1079_p7 = pnand %p1078_p4, %p1189_p5 }
  0xf4   : > { %v608_v9 = vadd.f32 %v607_v7, %v577_v6  ;;  %v540_v10 = vadd.f32 %v539_v1, %v1286_v42  ;;  %p1084_p11 = por %p1083_p10, %p1082_p9 }
  0xf5   : > { %p1080_p8 = pneg %p1079_p7 }
  0xf6   : > { %v541_v11 = vadd.f32 %v540_v10, %v1298_v48  ;;  %v609_v12 = vadd.f32 %v608_v9, %v578_v8 }
  0xf7   : > { %p1085_p12 = pnand %p1084_p11, %p1080_p8 }
  0xf8   : > { %v542_v30 = vadd.f32 %v541_v11, %v1308_v61  ;;  %v610_v15 = vadd.f32 %v609_v12, %v579_v24 }
  0xfa   : > { %v611_v36 = vadd.f32 %v610_v15, %v580_v13  ;;  %v543_v16 = vadd.f32 %v542_v30, %v1320_v14 }
  0xfc   : > { %v612_v18 = vadd.f32 %v611_v36, %v581_v17  ;;  %v544_v42 = vadd.f32 %v543_v16, %v435_v40 }
  0xfe   : > { %v545_v48 = vadd.f32 %v544_v42, %v1258_v29  ;;  %v613_v21 = vadd.f32 %v612_v18, %v582_v19  ;;  %v587_v29 = vmul.f32 %v1304_v53, %v1304_v53 }
 0x100   : > { %v546_v61 = vadd.f32 %v545_v48, %v1270_v34  ;;  %v614_v27 = vadd.f32 %v613_v21, %v583_v20 }
 0x102   : > { %v547_v14 = vadd.f32 %v546_v61, %v1282_v41  ;;  %v615_v31 = vadd.f32 %v614_v27, %v584_v25  ;;  %v588_v41 = vmul.f32 %v1314_v4, %v1314_v4 }
 0x104   : > { %v616_v35 = vadd.f32 %v615_v31, %v585_v28  ;;  %v548_v37 = vadd.f32 %v547_v14, %v1292_v46  ;;  %v589_v46 = vmul.f32 %v1323_v22, %v1323_v22 }
 0x106   : > { %v549_v39 = vadd.f32 %v548_v37, %v1304_v53  ;;  %v617_v23 = vadd.f32 %v616_v35, %v586_v33  ;;  %v590_v53 = vmul.f32 %v1345_v49, %v1345_v49 }
 0x108   : > { %v550_v34 = vadd.f32 %v549_v39, %v1314_v4  ;;  %v618_v40 = vadd.f32 %v617_v23, %v587_v29 }
 0x10a   : > { %v619_v43 = vadd.f32 %v618_v40, %v588_v41  ;;  %v551_v45 = vadd.f32 %v550_v34, %v1323_v22 }
 0x10c   : > { %v620_v47 = vadd.f32 %v619_v43, %v589_v46  ;;  %v552_v26 = vadd.f32 %v551_v45, %v1345_v49 }
 0x10e   : > { %v553_v32 = vrot.slane %v552_v26, 4  ;;  %v621_v51 = vadd.f32 %v620_v47, %v590_v53 }
 0x110   : > { %v554_v52 = vadd.f32 %v553_v32, %v552_v26  ;;  %v622_v54 = vrot.slane %v621_v51, 4 }
 0x112   : > { %v555_v38 = vrot.slane %v554_v52, 2  ;;  %v623_v55 = vadd.f32 %v622_v54, %v621_v51 }
 0x114   : > { %v556_v4 = vadd.f32 %v555_v38, %v554_v52  ;;  %v624_v56 = vrot.slane %v623_v55, 2 }
 0x116   : > { %v557_v22 = vrot.slane %v556_v4, 1  ;;  %v625_v44 = vadd.f32 %v624_v56, %v623_v55 }
 0x118   : > { %v626_v50 = vrot.slane %v625_v44, 1  ;;  %v558_v49 = vadd.f32 %v557_v22, %v556_v4 }
 0x11a   : > { %v627_v57 = vadd.f32 %v626_v50, %v625_v44 }
 0x11c   : > { %v629_v58 = vsel %vm628_vm2, %v558_v49, %v627_v57 }
 0x11d   : > { %630 = vst [vmem:[%s175_s24] sm:$0x3] %v629_v58 }
 0x11e   : > { %1088 = shalt.err (!%p1085_p12)
}
 0x11f   : > { %988 = dma.vmem_to_hbm [thread:$0]  (%p1189_p5), %s667_s25, 32, %s669_s26, %s637_s16  }
 0x120 PF: > { %p998_p13 = scmp.ge.s32.totalorder %s1127_s15, 2  ;;  %s680_s8 = sand.u32 1, %s1115_s12  }
 0x121   : > { %s681_s7 = scalar_lea.sflag [#allocation3], %s680_s8 }
 0x122   : > { %p992_p0 = pnand %p998_p13, %p1193_p6 }
 0x124   : > { %p993_p1 = pneg %p992_p0 }
 0x126   : > { %1106 = dma.done.wait (%p993_p1), %s681_s7, 2048  }
 0x127   : > { %1108 = vsyncadd (%p993_p1), %s681_s7, 4294965248  ;;  %s691_s9 = scalar_lea.sflag [#allocation5], %s680_s8 }
 0x128   : > { %1110 = dma.done.wait (%p993_p1), %s691_s9, 32  }
 0x129   : > { %1112 = vsyncadd (%p993_p1), %s691_s9, 4294967264  ;;  %p17_p5 = scmp.ge.s32.totalorder %s1176_s18, 4   ;;  %s1458_s12 = smov %s1119_s13 }
 0x12a   : > { %s1459_s13 = smov %s1123_s14  ;;  %s1460_s14 = smov %s1187_s21 }
 0x12b   : > { %s1461_s15 = smov %s1176_s18  ;;  %19 = sbr.rel (!%p17_p5) target bundleno = 5 (0x5), region = 80 }
 0x130   :  { %697 = vsyncpa [#allocation3], 1 }
 0x131   :  { %699 = vsyncpa [#allocation3 + $0x1], 1 }
 0x132   :  { %700 = vsyncpa [#allocation5], 1 }
 0x133   :  { %702 = vsyncpa [#allocation5 + $0x1], 1 }

</bundles_post_ra>
